<compile_context>
chip_gen: v7x
topology: tpu7x:2x2x1
jax: 0.10.0
libtpu: 0.0.40
codegen_flags: <defaults>
</compile_context>

<pallas_src>
import functools

import jax
import jax.numpy as jnp
from jax.experimental import pallas as pl
from jax.experimental.pallas import tpu as pltpu


def _l1_kernel(real_ref, fake_ref, out_ref, acc_ref, *,
               rows_total, block_rows, steps_per_core, need_mask, acc_rows):
    c = pl.program_id(0)   # "parallel" axis (megacore shard on multi-TC parts)
    i = pl.program_id(1)   # "arbitrary" reduction axis (last)

    @pl.when(i == 0)
    def _():
        acc_ref[...] = jnp.zeros_like(acc_ref)

    # HBM->VMEM traffic stays in the native input dtype; upcast on the VPU.
    contrib = jnp.abs(real_ref[...].astype(jnp.float32)
                      - fake_ref[...].astype(jnp.float32))

    def _fold(x):
        # Fold block rows into the small (acc_rows, width) accumulator with
        # pure VALU adds (no cross-lane/sublane movement).
        if acc_rows == block_rows:
            return x
        return x.reshape(block_rows // acc_rows, acc_rows, x.shape[-1]).sum(axis=0)

    if need_mask:
        blk = c * steps_per_core + i          # logical block index
        block_end = (blk + 1) * block_rows

        @pl.when(block_end <= rows_total)     # interior: no mask on hot path
        def _():
            acc_ref[...] += _fold(contrib)

        @pl.when(block_end > rows_total)      # edge / phantom block only
        def _():
            row_in_block = jax.lax.broadcasted_iota(jnp.int32, (block_rows, 1), 0)
            global_row = blk * block_rows + row_in_block
            # True elementwise select: safe even over stale rows of a partial
            # DMA (do NOT turn this into `mask * contrib`).
            masked = jnp.where(global_row < rows_total, contrib, 0.0)
            acc_ref[...] += _fold(masked)
    else:
        acc_ref[...] += _fold(contrib)

    @pl.when(i == pl.num_programs(1) - 1)
    def _():
        out_ref[0, 0] = jnp.sum(acc_ref[...])


def _tpu_plan():
    """Return (target HBM bytes per input block, preferred #cores)."""
    try:
        kind = jax.devices()[0].device_kind.lower()
    except Exception:
        kind = ""
    if "v7" in kind:
        return 4 << 20, 2        # 3.2 TB/s per TC, 2 TCs/chip, 32 MiB scoped VMEM
    if "v6" in kind:
        return 2 << 20, 1        # single TC
    if "v5p" in kind or "v4" in kind:
        return 2 << 20, 2        # megacore chips
    return 1 << 20, 1            # v5e / unknown: conservative


def l1_cost(real_batch: jax.Array, fake_batch: jax.Array) -> jax.Array:
    """Pallas equivalent of L1Cost.forward: mean(|real - fake|) over everything."""
    assert real_batch.shape == fake_batch.shape
    out_dtype = jnp.result_type(real_batch.dtype, fake_batch.dtype)

    n = real_batch.size
    if n == 0:
        return jnp.array(jnp.nan, dtype=out_dtype)

    flat_r = real_batch.reshape(-1)
    flat_f = fake_batch.reshape(-1)
    itemsize = max(flat_r.dtype.itemsize, flat_f.dtype.itemsize)

    # Lane width: largest power-of-two multiple of 128 (<= 1024) dividing N.
    width = None
    for w in (1024, 512, 256, 128):
        if n % w == 0:
            width = w
            break
    if width is None:
        width = 128
        n_main = (n // 128) * 128
    else:
        n_main = n

    # Ragged (<128-element) tail handled in plain JAX (tiny), no full-tensor pad.
    if n_main != n:
        tail_sum = jnp.sum(jnp.abs(flat_r[n_main:].astype(jnp.float32)
                                   - flat_f[n_main:].astype(jnp.float32)))
    else:
        tail_sum = None

    if n_main == 0:
        total = tail_sum
    else:
        if n_main != n:
            r2d = flat_r[:n_main].reshape(-1, width)
            f2d = flat_f[:n_main].reshape(-1, width)
        else:
            r2d = flat_r.reshape(-1, width)
            f2d = flat_f.reshape(-1, width)
        rows = n_main // width

        target_bytes, num_cores_pref = _tpu_plan()
        # Size blocks by the actual input dtype so DMA efficiency is constant
        # across f32/bf16/int8. target_rows is a power of two >= 8.
        target_rows = max(8, target_bytes // (width * itemsize))
        block_rows = rows if rows <= target_rows else target_rows
        num_row_blocks = -(-rows // block_rows)

        num_cores = num_cores_pref if num_row_blocks >= 2 else 1
        steps = -(-num_row_blocks // num_cores)
        need_mask = (num_cores * steps * block_rows) != rows
        # Vreg-row accumulator: 8 sublanes when block rows fold evenly.
        acc_rows = 8 if block_rows % 8 == 0 else block_rows

        if num_cores * steps == num_row_blocks:
            def in_map(c, i):
                return (c * steps + i, 0)
        else:
            def in_map(c, i):
                # Clamp phantom block indices (never DMA out of bounds); their
                # contribution is zeroed by the edge-step mask.
                return (jnp.minimum(c * steps + i, num_row_blocks - 1), 0)

        kernel = functools.partial(
            _l1_kernel,
            rows_total=rows,
            block_rows=block_rows,
            steps_per_core=steps,
            need_mask=need_mask,
            acc_rows=acc_rows,
        )

        partials = pl.pallas_call(
            kernel,
            out_shape=jax.ShapeDtypeStruct((num_cores, 1), jnp.float32),
            grid_spec=pltpu.PrefetchScalarGridSpec(
                num_scalar_prefetch=0,
                grid=(num_cores, steps),
                in_specs=[
                    pl.BlockSpec((block_rows, width), in_map),
                    pl.BlockSpec((block_rows, width), in_map),
                ],
                out_specs=pl.BlockSpec(
                    (1, 1), lambda c, i: (c, 0), memory_space=pltpu.SMEM
                ),
                scratch_shapes=[pltpu.VMEM((acc_rows, width), jnp.float32)],
            ),
            compiler_params=pltpu.CompilerParams(
                dimension_semantics=("parallel", "arbitrary"),
            ),
            cost_estimate=pl.CostEstimate(
                flops=3 * n_main,
                transcendentals=0,
                bytes_accessed=n_main * (flat_r.dtype.itemsize
                                         + flat_f.dtype.itemsize),
            ),
        )(r2d, f2d)

        total = jnp.sum(partials)
        if tail_sum is not None:
            total = total + tail_sum

    return (total / jnp.float32(n)).astype(out_dtype)


if __name__ == "__main__":
    key = jax.random.PRNGKey(0)
    k_real, k_fake = jax.random.split(key)

    shape = (2, 4, 16, 16)  # B, C, H, W
    real = jax.random.normal(k_real, shape, dtype=jnp.float32)
    fake = jax.random.normal(k_fake, shape, dtype=jnp.float32)

    loss = jax.block_until_ready(l1_cost(real, fake))

    # Sanity check against plain JAX (same semantics as F.l1_loss on the
    # (B, -1) reshaped tensors).
    ref = jnp.mean(jnp.abs(real.reshape(shape[0], -1) - fake.reshape(shape[0], -1)))
    assert jnp.allclose(loss, ref, rtol=1e-6, atol=1e-6), (loss, ref)

    print("KERNEL_OK")
</pallas_src>

<mosaic_0001>
module attributes {stable_mosaic.version = 11 : i64} {
  func.func @_l1_kernel(%arg0: i32, %arg1: i32, %arg2: memref<2x1024xf32, #tpu.memory_space<vmem>>, %arg3: memref<2x1024xf32, #tpu.memory_space<vmem>>, %arg4: memref<1x1xf32, #tpu.memory_space<smem>>, %arg5: memref<2x1024xf32, #tpu.memory_space<vmem>>) attributes {dimension_semantics = [#tpu.dimension_semantics<parallel>, #tpu.dimension_semantics<arbitrary>], iteration_bounds = array<i64: 1, 1>, scalar_prefetch = 0 : i64, scratch_operands = 1 : i64, tpu.core_type = #tpu.core_type<tc>, window_params = [{transform_indices = @transform_0, window_bounds = array<i64: 2, 1024>}, {transform_indices = @transform_1, window_bounds = array<i64: 2, 1024>}, {transform_indices = @transform_2, window_bounds = array<i64: 1, 1>}]} {
    %c0_i32 = arith.constant 0 : i32
    %0 = arith.cmpi eq, %arg1, %c0_i32 : i32
    %1 = arith.extui %0 : i1 to i32
    %c0_i32_0 = arith.constant 0 : i32
    %2 = arith.cmpi ne, %1, %c0_i32_0 : i32
    scf.if %2 {
      %cst = arith.constant 0.000000e+00 : f32
      %13 = vector.broadcast %cst : f32 to vector<2x1024xf32>
      %c0_10 = arith.constant 0 : index
      %c0_11 = arith.constant 0 : index
      %14 = vector.load %arg5[%c0_10, %c0_11] : memref<2x1024xf32, #tpu.memory_space<vmem>>, vector<2x1024xf32>
      tpu.vector_store %arg5[%c0_10, %c0_11], %13 {strides = array<i32>} : memref<2x1024xf32, #tpu.memory_space<vmem>>, vector<2x1024xf32>,
    } else {
    }
    %c0 = arith.constant 0 : index
    %c0_1 = arith.constant 0 : index
    %3 = vector.load %arg2[%c0, %c0_1] : memref<2x1024xf32, #tpu.memory_space<vmem>>, vector<2x1024xf32>
    %c0_2 = arith.constant 0 : index
    %c0_3 = arith.constant 0 : index
    %4 = vector.load %arg3[%c0_2, %c0_3] : memref<2x1024xf32, #tpu.memory_space<vmem>>, vector<2x1024xf32>
    %5 = arith.subf %3, %4 : vector<2x1024xf32>
    %6 = math.absf %5 : vector<2x1024xf32>
    %c0_4 = arith.constant 0 : index
    %c0_5 = arith.constant 0 : index
    %7 = vector.load %arg5[%c0_4, %c0_5] : memref<2x1024xf32, #tpu.memory_space<vmem>>, vector<2x1024xf32>
    %8 = arith.addf %7, %6 : vector<2x1024xf32>
    %c0_6 = arith.constant 0 : index
    %c0_7 = arith.constant 0 : index
    %9 = vector.load %arg5[%c0_6, %c0_7] : memref<2x1024xf32, #tpu.memory_space<vmem>>, vector<2x1024xf32>
    tpu.vector_store %arg5[%c0_6, %c0_7], %8 {strides = array<i32>} : memref<2x1024xf32, #tpu.memory_space<vmem>>, vector<2x1024xf32>,
    %c0_i32_8 = arith.constant 0 : i32
    %10 = arith.cmpi eq, %arg1, %c0_i32_8 : i32
    %11 = arith.extui %10 : i1 to i32
    %c0_i32_9 = arith.constant 0 : i32
    %12 = arith.cmpi ne, %11, %c0_i32_9 : i32
    scf.if %12 {
      %c0_10 = arith.constant 0 : index
      %c0_11 = arith.constant 0 : index
      %13 = vector.load %arg5[%c0_10, %c0_11] : memref<2x1024xf32, #tpu.memory_space<vmem>>, vector<2x1024xf32>
      %14 = vector.shape_cast %13 : vector<2x1024xf32> to vector<1x2x1024xf32>
      %cst = arith.constant dense<0.000000e+00> : vector<1xf32>
      %15 = vector.multi_reduction <add>, %14, %cst [1, 2] : vector<1x2x1024xf32> to vector<1xf32>
      %16 = vector.shape_cast %15 : vector<1xf32> to vector<1x1x1xf32>
      %17 = vector.extract %16[0, 0, 0] : f32 from vector<1x1x1xf32>
      %c0_12 = arith.constant 0 : index
      %c0_13 = arith.constant 0 : index
      %18 = memref.load %arg4[%c0_12, %c0_13] : memref<1x1xf32, #tpu.memory_space<smem>>
      memref.store %17, %arg4[%c0_12, %c0_13] : memref<1x1xf32, #tpu.memory_space<smem>>
    } else {
    }
    return
  }
  func.func @transform_0(%arg0: i32, %arg1: i32) -> (i32, i32) {
    %c1_i32 = arith.constant 1 : i32
    %0 = arith.muli %arg0, %c1_i32 : i32
    %1 = arith.addi %0, %arg1 : i32
    %c0_i32 = arith.constant 0 : i32
    %c0_i32_0 = arith.constant 0 : i32
    return %1, %c0_i32 : i32, i32
  }
  func.func @transform_1(%arg0: i32, %arg1: i32) -> (i32, i32) {
    %c1_i32 = arith.constant 1 : i32
    %0 = arith.muli %arg0, %c1_i32 : i32
    %1 = arith.addi %0, %arg1 : i32
    %c0_i32 = arith.constant 0 : i32
    %c0_i32_0 = arith.constant 0 : i32
    return %1, %c0_i32 : i32, i32
  }
  func.func @transform_2(%arg0: i32, %arg1: i32) -> (i32, i32) {
    %c0_i32 = arith.constant 0 : i32
    %c0_i32_0 = arith.constant 0 : i32
    return %arg0, %c0_i32 : i32, i32
  }
}

</mosaic_0001>

<bundles_post_ra>
// kernel: tpu_custom_call.1
= control target key start
LH: loop header
LB: loop body
LE: loop exit
PB: predicated region body
PF: predicated region fallthrough
CT: control target
= control target key end

     0   :  { %7 = vsyncpa [#allocation4], 0  ;;  %s286_s0 = inlined_call_operand.hbm [shape: f32[2,1024], index: 0, kind: input, shape index: {}]   ;;  %s287_s1 = inlined_call_operand.hbm [shape: f32[2,1024], index: 1, kind: input, shape index: {}]   ;;  %s288_s2 = inlined_call_operand.hbm [shape: f32[1,1], index: 2, kind: output, shape index: {}]  }
   0x1   :  { %8 = vsyncpa [#allocation7], 0 }
   0x2   :  { %9 = vsyncpa [#allocation5], 0  ;;  %s223_s9 = smov [#allocation3]   ;;  %s224_s11 = smov [#allocation6]  }
   0x3   :  { %s20_s10 = sshll.u32 %s223_s9, 4  ;;  %s34_s12 = sshll.u32 %s224_s11, 4  ;;  %s21_s10 = int_to_ptr.vmem [resolvable:$true] %s20_s10  ;;  %s35_s12 = int_to_ptr.vmem [resolvable:$true] %s34_s12 }
   0x4   :  { %s163_s15 = scalar_lea.hbm %s286_s0, 256 }
   0x5   :  { %p164_p0 = scmp.ne.s32.totalorder %s286_s0, %s163_s15  ;;  %p167_p1 = scmp.lt.u32.totalorder %s163_s15, %s286_s0 }
   0x7   :  { %p169_p2 = pnand %p167_p1, %p164_p0 }
   0x9   :  { %172 = shalt.err (!%p169_p2)
}
   0xa   :  { %s173_s20 = scalar_lea.vmem %s21_s10, 256  ;;  %p178_p4 = scmp.lt.s32.totalorder %s21_s10, %s21_s10 }
   0xb   :  { %p174_p3 = scmp.ne.s32.totalorder %s21_s10, %s173_s20  ;;  %p179_p5 = scmp.lt.s32.totalorder %s173_s20, %s173_s20 }
   0xd   :  { %p180_p6 = por %p179_p5, %p178_p4 }
   0xf   :  { %p181_p7 = pnand %p180_p6, %p174_p3 }
  0x11   :  { %184 = shalt.err (!%p181_p7)
}
  0x12   :  { %23 = dma.hbm_to_vmem [thread:$0]  %s286_s0, 256, %s21_s10, [#allocation4]  }
  0x13   :  { %s185_s25 = scalar_lea.hbm %s287_s1, 256 }
  0x14   :  { %p186_p8 = scmp.ne.s32.totalorder %s287_s1, %s185_s25  ;;  %p189_p9 = scmp.lt.u32.totalorder %s185_s25, %s287_s1 }
  0x16   :  { %p191_p10 = pnand %p189_p9, %p186_p8 }
  0x18   :  { %194 = shalt.err (!%p191_p10)
}
  0x19   :  { %s195_s30 = scalar_lea.vmem %s35_s12, 256  ;;  %p200_p12 = scmp.lt.s32.totalorder %s35_s12, %s35_s12 }
  0x1a   :  { %p196_p11 = scmp.ne.s32.totalorder %s35_s12, %s195_s30  ;;  %p201_p13 = scmp.lt.s32.totalorder %s195_s30, %s195_s30 }
  0x1c   :  { %p202_p0 = por %p201_p13, %p200_p12 }
  0x1e   :  { %p203_p1 = pnand %p202_p0, %p196_p11 }
  0x20   :  { %206 = shalt.err (!%p203_p1)
}
  0x21   :  { %37 = dma.hbm_to_vmem [thread:$0]  %s287_s1, 256, %s35_s12, [#allocation7]  }
  0x22   :  { %217 = dma.done.wait [#allocation4], 256  }
  0x23   :  { %218 = vsyncadd [#allocation4], 4294967040 }
  0x24   :  { %219 = dma.done.wait [#allocation7], 256  }
  0x25   :  { %220 = vsyncadd [#allocation7], 4294967040  ;;  %v77_v0 = vlaneseq  ;;  %v225_v1 = vmov 1983009808   ;;  %v52_v5 = vld [vmem:[#allocation3] sm:$0xff]  ;;  %v53_v6 = vld [vmem:[#allocation3 + $0x8] sm:$0xff] }
  0x26   :  { %v75_v2 = vunpack.c.l.s4 %v225_v1  ;;  %v54_v7 = vld [vmem:[#allocation6] sm:$0xff]  ;;  %v55_v8 = vld [vmem:[#allocation6 + $0x8] sm:$0xff]  ;;  %vm115_vm0 = vcmask 1041408   ;;  %s207_s6 = scalar_lea.hbm %s288_s2, 16 }
  0x27   :  { %v78_v4 = vshrl.u32 %v77_v0, 7  ;;  %v56_v9 = vsub.f32 %v52_v5, %v54_v7  ;;  %v57_v11 = vsub.f32 %v53_v6, %v55_v8  ;;  %p208_p2 = scmp.ne.s32.totalorder %s288_s2, %s207_s6  ;;  %p211_p3 = scmp.lt.u32.totalorder %s207_s6, %s288_s2 }
  0x28   :  { %v76_v3 = vunpack.c.0.s8 %v75_v2 }
  0x29   :  { %v58_v12 = vand.u32 2147483647, %v56_v9  ;;  %v59_v13 = vand.u32 2147483647, %v57_v11  ;;  %p213_p4 = pnand %p211_p3, %p208_p2 }
  0x2a   :  { %v79_v10 = vsub.s32 %v76_v3, %v78_v4 }
  0x2b   :  { %v73_v14 = vcombine.high %v58_v12, %v58_v12  ;;  %v90_v16 = vcombine.high %v59_v13, %v59_v13 }
  0x2c   :  { %v80_v15 = vrot.slane %v58_v12, %v79_v10  ;;  %v97_v19 = vrot.slane %v59_v13, %v79_v10 }
  0x2d   :  { %v87_v17 = vrot.slane %v73_v14, %v79_v10  ;;  %v104_v25 = vrot.slane %v90_v16, %v79_v10 }
  0x2e   :  { %v88_v18 = vcombine.high %v80_v15, %v80_v15  ;;  %v116_v20 = vsel %vm115_vm0, %v80_v15, 0.0  ;;  %v105_v26 = vcombine.high %v97_v19, %v97_v19  ;;  %v123_v29 = vsel %vm115_vm0, %v97_v19, 0.0 }
  0x2f   :  { %v89_v21 = vcombine.high %v87_v17, %v87_v17  ;;  %v119_v23 = vsel %vm115_vm0, %v87_v17, 0.0  ;;  %v106_v31 = vcombine.high %v104_v25, %v104_v25  ;;  %v127_v34 = vsel %vm115_vm0, %v104_v25, 0.0 }
  0x30   :  { %v117_v22 = vsel %vm115_vm0, %v88_v18, 0.0  ;;  %v125_v32 = vsel %vm115_vm0, %v105_v26, 0.0 }
  0x31   :  { %v118_v24 = vadd.f32 %v117_v22, %v116_v20  ;;  %v121_v27 = vsel %vm115_vm0, %v89_v21, 0.0  ;;  %v129_v36 = vsel %vm115_vm0, %v106_v31, 0.0 }
  0x33   :  { %v120_v28 = vadd.f32 %v119_v23, %v118_v24 }
  0x35   :  { %v122_v30 = vadd.f32 %v121_v27, %v120_v28 }
  0x37   :  { %v124_v33 = vadd.f32 %v123_v29, %v122_v30 }
  0x39   :  { %v126_v35 = vadd.f32 %v125_v32, %v124_v33 }
  0x3b   :  { %v128_v37 = vadd.f32 %v127_v34, %v126_v35 }
  0x3d   :  { %v130_v38 = vadd.f32 %v129_v36, %v128_v37 }
  0x3f   :  { %131 = vadd.xlane.f32.xlu0 %v130_v38 }
  0xcc   :  { %v132_v39 = vpop.xlane.xlu0 %131 }
  0xcd   :  { %v133_v40 = vrot.slane %v132_v39, 4 }
  0xcf   :  { %v134_v41 = vadd.f32 %v133_v40, %v132_v39 }
  0xd1   :  { %v135_v42 = vrot.slane %v134_v41, 2 }
  0xd3   :  { %v136_v43 = vadd.f32 %v135_v42, %v134_v41 }
  0xd5   :  { %v137_v44 = vrot.slane %v136_v43, 1 }
  0xd7   :  { %v138_v45 = vadd.f32 %v137_v44, %v136_v43 }
  0xd9   :  { %157 = vpush %v138_v45 }
 0x10a   :  { %s158_s1 = spop %157 }
 0x10b   :  { %141 = sst [smem:[#allocation8]] %s158_s1 }
 0x10c   :  { %216 = shalt.err (!%p213_p4)
}
 0x10d   :  { %s226_s11 = smov [#allocation8]  }
 0x10e   :  { %149 = dma.smem_to_hbm %s226_s11, 16, %s288_s2, [#allocation5]  }
 0x10f   :  { %221 = dma.done.wait [#allocation5], 16  }
 0x110   :  { %222 = vsyncadd [#allocation5], 4294967280 }
 0x111   :  { %153 = sfence }
 0x112   :  { %154 = vsyncpa [#allocation4], 1 }
 0x113   :  { %155 = vsyncpa [#allocation7], 1 }
 0x114   :  { %156 = vsyncpa [#allocation5], 1 }

</bundles_post_ra>
